<compile_context>
chip_gen: v7x
topology: tpu7x:2x2x1
jax: 0.10.0
libtpu: 0.0.40
codegen_flags: <defaults>
</compile_context>

<pallas_src>
import functools

import jax
import jax.numpy as jnp
from jax.experimental import pallas as pl
from jax.experimental.pallas import tpu as pltpu

_LANE = 128        # lane width (last-dim tile)
_SUBLANE = 8       # sublane width (second-to-last-dim tile, f32)
_MAX_TILE_B = 256  # fills MXU M rows on v6e/v7x; multiple of 128 for v5e too


def _round_up(x, m):
    return (x + m - 1) // m * m


def _choose_batch_tile(batch):
    """Pick (tile_b, padded_batch): tile_b multiple of 8, <= _MAX_TILE_B, and
    sized to minimize padding waste for the given batch."""
    n_tiles = max(1, -(-batch // _MAX_TILE_B))            # ceil div
    tile_b = _round_up(max(1, -(-batch // n_tiles)), _SUBLANE)
    tile_b = min(tile_b, _MAX_TILE_B)
    b_pad = tile_b * n_tiles
    # Guard: rounding tile_b down to the cap could under-cover the batch.
    while b_pad < batch:
        n_tiles += 1
        b_pad = tile_b * n_tiles
    return tile_b, b_pad


def _actor_kernel(x_ref, w1_ref, b1_ref, w2_ref, b2_ref, w3_ref, b3_ref,
                  o_ref, *, max_action):
    # MXU matmuls in bf16 with f32 accumulation; elementwise math in f32.
    x = x_ref[...].astype(jnp.bfloat16)
    h = jnp.dot(x, w1_ref[...], preferred_element_type=jnp.float32)
    h = jnp.maximum(h + b1_ref[...], 0.0)

    h = jnp.dot(h.astype(jnp.bfloat16), w2_ref[...],
                preferred_element_type=jnp.float32)
    h = jnp.maximum(h + b2_ref[...], 0.0)

    a = jnp.dot(h.astype(jnp.bfloat16), w3_ref[...],
                preferred_element_type=jnp.float32)
    a = max_action * jnp.tanh(a + b3_ref[...])
    o_ref[...] = a.astype(o_ref.dtype)


def prepare_actor_params(params):
    """One-time conversion of f32 (in,out) params for the kernel:
       * weights -> bf16 (MXU operands, half the weight DMA traffic)
       * biases stay f32 (added to the f32 accumulator)
       * last layer padded to a multiple of 128 output lanes so the kernel's
         final store is lane-dense (unmasked)."""
    w3 = params["w3"]
    b3 = params["b3"]
    action_dim = w3.shape[1]
    a_pad = _round_up(action_dim, _LANE)
    if a_pad != action_dim:
        w3 = jnp.pad(w3, ((0, 0), (0, a_pad - action_dim)))
        b3 = jnp.pad(b3, ((0, 0), (0, a_pad - action_dim)))
    return {
        "w1": params["w1"].astype(jnp.bfloat16),
        "b1": params["b1"].astype(jnp.float32),
        "w2": params["w2"].astype(jnp.bfloat16),
        "b2": params["b2"].astype(jnp.float32),
        "w3": w3.astype(jnp.bfloat16),
        "b3": b3.astype(jnp.float32),
        "action_dim": action_dim,
    }


def actor_forward(x, prepared, max_action):
    """x: (B, state_dim) f32.  prepared: output of prepare_actor_params."""
    w1, b1 = prepared["w1"], prepared["b1"]
    w2, b2 = prepared["w2"], prepared["b2"]
    w3, b3 = prepared["w3"], prepared["b3"]
    action_dim = prepared["action_dim"]

    B, S = x.shape
    H = w1.shape[1]
    A_pad = w3.shape[1]

    tile_b, b_pad = _choose_batch_tile(B)
    if b_pad != B:
        x = jnp.pad(x, ((0, b_pad - B), (0, 0)))

    grid = (b_pad // tile_b,)

    flops = 2 * b_pad * (S * H + H * H + H * A_pad)
    bytes_accessed = (
        b_pad * S * 4                                   # x (f32)
        + (w1.size + w2.size + w3.size) * 2             # bf16 weights
        + (b1.size + b2.size + b3.size) * 4             # f32 biases
        + b_pad * A_pad * 4                             # output (f32)
    )
    cost = pl.CostEstimate(flops=flops,
                           transcendentals=b_pad * A_pad,   # tanh
                           bytes_accessed=bytes_accessed)

    kernel = functools.partial(_actor_kernel, max_action=float(max_action))

    def resident(a):
        # Full-array block, constant block index -> stays in VMEM across the
        # whole grid (weights/biases DMA'd once).
        return pl.BlockSpec(a.shape, lambda i: (0,) * a.ndim)

    out = pl.pallas_call(
        kernel,
        out_shape=jax.ShapeDtypeStruct((b_pad, A_pad), jnp.float32),
        grid=grid,
        in_specs=[
            pl.BlockSpec((tile_b, S), lambda i: (i, 0)),   # x, tiled over batch
            resident(w1), resident(b1),
            resident(w2), resident(b2),
            resident(w3), resident(b3),
        ],
        out_specs=pl.BlockSpec((tile_b, A_pad), lambda i: (i, 0)),
        compiler_params=pltpu.CompilerParams(
            dimension_semantics=("parallel",),   # shard batch tiles over TCs (v7x)
            # Weights + double-buffered x/out tiles stay well under 32 MiB even
            # at hidden=2048 bf16; explicit budget keeps headroom on v7x's
            # 64 MiB VMEM.
            vmem_limit_bytes=32 * 1024 * 1024,
        ),
        cost_estimate=cost,
    )(x, w1, b1, w2, b2, w3, b3)

    return out[:B, :action_dim]


def init_actor_params(key, state_dim, action_dim, hidden_dim=256):
    """Deterministic synthetic init (Kaiming-uniform-ish like nn.Linear)."""
    ks = jax.random.split(key, 6)

    def linear(kw, kb, fan_in, fan_out):
        bound = 1.0 / jnp.sqrt(fan_in)
        w = jax.random.uniform(kw, (fan_in, fan_out), jnp.float32, -bound, bound)
        b = jax.random.uniform(kb, (1, fan_out), jnp.float32, -bound, bound)
        return w, b

    w1, b1 = linear(ks[0], ks[1], state_dim, hidden_dim)
    w2, b2 = linear(ks[2], ks[3], hidden_dim, hidden_dim)
    w3, b3 = linear(ks[4], ks[5], hidden_dim, action_dim)
    return {"w1": w1, "b1": b1, "w2": w2, "b2": b2, "w3": w3, "b3": b3}


def _reference(x, params, max_action):
    h = jnp.maximum(x @ params["w1"] + params["b1"], 0.0)
    h = jnp.maximum(h @ params["w2"] + params["b2"], 0.0)
    return max_action * jnp.tanh(h @ params["w3"] + params["b3"])


if __name__ == "__main__":
    # Small shapes consistent with an RL actor MLP.
    batch = 2
    state_dim = 8
    action_dim = 4
    hidden_dim = 32
    max_action = 2.0

    key = jax.random.PRNGKey(0)
    kx, kp, kx2 = jax.random.split(key, 3)
    x = jax.random.normal(kx, (batch, state_dim), jnp.float32)
    params = init_actor_params(kp, state_dim, action_dim, hidden_dim)
    prepared = prepare_actor_params(params)

    # --- primary check at the spec'd small shape (single grid step) ---
    out = actor_forward(x, prepared, max_action)
    out = jax.block_until_ready(out)
    ref = _reference(x, params, max_action)
    assert out.shape == (batch, action_dim)
    # bf16 MXU operands with f32 accumulation: relax tolerance vs. pure-f32 ref.
    assert jnp.allclose(out, ref, atol=3e-2, rtol=3e-2), (
        f"max abs err {jnp.max(jnp.abs(out - ref))}")

    # --- second check exercising multiple grid steps + batch padding ---
    big_b = 300  # 2 tiles of 152 rows -> pads to 304, grid=(2,)
    x_big = jax.random.normal(kx2, (big_b, state_dim), jnp.float32)
    out_big = jax.block_until_ready(actor_forward(x_big, prepared, max_action))
    ref_big = _reference(x_big, params, max_action)
    assert out_big.shape == (big_b, action_dim)
    assert jnp.allclose(out_big, ref_big, atol=3e-2, rtol=3e-2), (
        f"max abs err {jnp.max(jnp.abs(out_big - ref_big))}")

    print("KERNEL_OK")
</pallas_src>

<mosaic_0001>
module attributes {stable_mosaic.version = 11 : i64} {
  func.func @_actor_kernel(%arg0: i32, %arg1: memref<8x8xf32, #tpu.memory_space<vmem>>, %arg2: memref<8x32xbf16, #tpu.memory_space<vmem>>, %arg3: memref<1x32xf32, #tpu.memory_space<vmem>>, %arg4: memref<32x32xbf16, #tpu.memory_space<vmem>>, %arg5: memref<1x32xf32, #tpu.memory_space<vmem>>, %arg6: memref<32x128xbf16, #tpu.memory_space<vmem>>, %arg7: memref<1x128xf32, #tpu.memory_space<vmem>>, %arg8: memref<8x128xf32, #tpu.memory_space<vmem>>) attributes {dimension_semantics = [#tpu.dimension_semantics<parallel>], iteration_bounds = array<i64: 1>, scalar_prefetch = 0 : i64, scratch_operands = 0 : i64, tpu.core_type = #tpu.core_type<tc>, window_params = [{transform_indices = @transform_0, window_bounds = array<i64: 8, 8>}, {pipeline_mode = #tpu.pipeline_mode<synchronous>, transform_indices = @transform_1, window_bounds = array<i64: 8, 32>}, {pipeline_mode = #tpu.pipeline_mode<synchronous>, transform_indices = @transform_2, window_bounds = array<i64: 1, 32>}, {pipeline_mode = #tpu.pipeline_mode<synchronous>, transform_indices = @transform_3, window_bounds = array<i64: 32, 32>}, {pipeline_mode = #tpu.pipeline_mode<synchronous>, transform_indices = @transform_4, window_bounds = array<i64: 1, 32>}, {pipeline_mode = #tpu.pipeline_mode<synchronous>, transform_indices = @transform_5, window_bounds = array<i64: 32, 128>}, {pipeline_mode = #tpu.pipeline_mode<synchronous>, transform_indices = @transform_6, window_bounds = array<i64: 1, 128>}, {transform_indices = @transform_7, window_bounds = array<i64: 8, 128>}]} {
    %c0 = arith.constant 0 : index
    %c0_0 = arith.constant 0 : index
    %0 = vector.load %arg1[%c0, %c0_0] : memref<8x8xf32, #tpu.memory_space<vmem>>, vector<8x8xf32>
    %1 = arith.truncf %0 : vector<8x8xf32> to vector<8x8xbf16>
    %c0_1 = arith.constant 0 : index
    %c0_2 = arith.constant 0 : index
    %2 = vector.load %arg2[%c0_1, %c0_2] : memref<8x32xbf16, #tpu.memory_space<vmem>>, vector<8x32xbf16>
    %cst = arith.constant dense<0.000000e+00> : vector<8x32xf32>
    %3 = tpu.matmul %1, %2, %cst {dimension_numbers = #tpu.dot_dimension_numbers<[1], [0], [0], [1], [0, 0, 1, 1], [], []>} : vector<8x8xbf16>, vector<8x32xbf16>, vector<8x32xf32> -> vector<8x32xf32>
    %c0_3 = arith.constant 0 : index
    %c0_4 = arith.constant 0 : index
    %4 = vector.load %arg3[%c0_3, %c0_4] : memref<1x32xf32, #tpu.memory_space<vmem>>, vector<1x32xf32>
    %5 = vector.broadcast %4 : vector<1x32xf32> to vector<8x32xf32>
    %6 = arith.addf %3, %5 : vector<8x32xf32>
    %cst_5 = arith.constant 0.000000e+00 : f32
    %7 = vector.broadcast %cst_5 : f32 to vector<8x32xf32>
    %8 = arith.maximumf %6, %7 : vector<8x32xf32>
    %9 = arith.truncf %8 : vector<8x32xf32> to vector<8x32xbf16>
    %c0_6 = arith.constant 0 : index
    %c0_7 = arith.constant 0 : index
    %10 = vector.load %arg4[%c0_6, %c0_7] : memref<32x32xbf16, #tpu.memory_space<vmem>>, vector<32x32xbf16>
    %cst_8 = arith.constant dense<0.000000e+00> : vector<8x32xf32>
    %11 = tpu.matmul %9, %10, %cst_8 {dimension_numbers = #tpu.dot_dimension_numbers<[1], [0], [0], [1], [0, 0, 1, 1], [], []>} : vector<8x32xbf16>, vector<32x32xbf16>, vector<8x32xf32> -> vector<8x32xf32>
    %c0_9 = arith.constant 0 : index
    %c0_10 = arith.constant 0 : index
    %12 = vector.load %arg5[%c0_9, %c0_10] : memref<1x32xf32, #tpu.memory_space<vmem>>, vector<1x32xf32>
    %13 = vector.broadcast %12 : vector<1x32xf32> to vector<8x32xf32>
    %14 = arith.addf %11, %13 : vector<8x32xf32>
    %cst_11 = arith.constant 0.000000e+00 : f32
    %15 = vector.broadcast %cst_11 : f32 to vector<8x32xf32>
    %16 = arith.maximumf %14, %15 : vector<8x32xf32>
    %17 = arith.truncf %16 : vector<8x32xf32> to vector<8x32xbf16>
    %c0_12 = arith.constant 0 : index
    %c0_13 = arith.constant 0 : index
    %18 = vector.load %arg6[%c0_12, %c0_13] : memref<32x128xbf16, #tpu.memory_space<vmem>>, vector<32x128xbf16>
    %cst_14 = arith.constant dense<0.000000e+00> : vector<8x128xf32>
    %19 = tpu.matmul %17, %18, %cst_14 {dimension_numbers = #tpu.dot_dimension_numbers<[1], [0], [0], [1], [0, 0, 1, 1], [], []>} : vector<8x32xbf16>, vector<32x128xbf16>, vector<8x128xf32> -> vector<8x128xf32>
    %c0_15 = arith.constant 0 : index
    %c0_16 = arith.constant 0 : index
    %20 = vector.load %arg7[%c0_15, %c0_16] : memref<1x128xf32, #tpu.memory_space<vmem>>, vector<1x128xf32>
    %21 = vector.broadcast %20 : vector<1x128xf32> to vector<8x128xf32>
    %22 = arith.addf %19, %21 : vector<8x128xf32>
    %23 = math.tanh %22 : vector<8x128xf32>
    %cst_17 = arith.constant 2.000000e+00 : f32
    %24 = vector.broadcast %cst_17 : f32 to vector<8x128xf32>
    %25 = arith.mulf %24, %23 : vector<8x128xf32>
    %c0_18 = arith.constant 0 : index
    %c0_19 = arith.constant 0 : index
    %26 = vector.load %arg8[%c0_18, %c0_19] : memref<8x128xf32, #tpu.memory_space<vmem>>, vector<8x128xf32>
    tpu.vector_store %arg8[%c0_18, %c0_19], %25 {strides = array<i32>} : memref<8x128xf32, #tpu.memory_space<vmem>>, vector<8x128xf32>,
    return
  }
  func.func @transform_0(%arg0: i32) -> (i32, i32) {
    %c0_i32 = arith.constant 0 : i32
    %c0_i32_0 = arith.constant 0 : i32
    return %arg0, %c0_i32 : i32, i32
  }
  func.func @transform_1(%arg0: i32) -> (i32, i32) {
    %c0_i32 = arith.constant 0 : i32
    %c0_i32_0 = arith.constant 0 : i32
    %c0_i32_1 = arith.constant 0 : i32
    return %c0_i32, %c0_i32_0 : i32, i32
  }
  func.func @transform_2(%arg0: i32) -> (i32, i32) {
    %c0_i32 = arith.constant 0 : i32
    %c0_i32_0 = arith.constant 0 : i32
    %c0_i32_1 = arith.constant 0 : i32
    return %c0_i32, %c0_i32_0 : i32, i32
  }
  func.func @transform_3(%arg0: i32) -> (i32, i32) {
    %c0_i32 = arith.constant 0 : i32
    %c0_i32_0 = arith.constant 0 : i32
    %c0_i32_1 = arith.constant 0 : i32
    return %c0_i32, %c0_i32_0 : i32, i32
  }
  func.func @transform_4(%arg0: i32) -> (i32, i32) {
    %c0_i32 = arith.constant 0 : i32
    %c0_i32_0 = arith.constant 0 : i32
    %c0_i32_1 = arith.constant 0 : i32
    return %c0_i32, %c0_i32_0 : i32, i32
  }
  func.func @transform_5(%arg0: i32) -> (i32, i32) {
    %c0_i32 = arith.constant 0 : i32
    %c0_i32_0 = arith.constant 0 : i32
    %c0_i32_1 = arith.constant 0 : i32
    return %c0_i32, %c0_i32_0 : i32, i32
  }
  func.func @transform_6(%arg0: i32) -> (i32, i32) {
    %c0_i32 = arith.constant 0 : i32
    %c0_i32_0 = arith.constant 0 : i32
    %c0_i32_1 = arith.constant 0 : i32
    return %c0_i32, %c0_i32_0 : i32, i32
  }
  func.func @transform_7(%arg0: i32) -> (i32, i32) {
    %c0_i32 = arith.constant 0 : i32
    %c0_i32_0 = arith.constant 0 : i32
    return %arg0, %c0_i32 : i32, i32
  }
}

</mosaic_0001>

<bundles_post_ra>
// kernel: tpu_custom_call.1
= control target key start
LH: loop header
LB: loop body
LE: loop exit
PB: predicated region body
PF: predicated region fallthrough
CT: control target
= control target key end

     0   :  { %12 = vsyncpa [#allocation3], 0  ;;  %s538_s0 = inlined_call_operand.hbm [shape: f32[8,8], index: 0, kind: input, shape index: {}]   ;;  %s539_s1 = inlined_call_operand.hbm [shape: bf16[8,32], index: 1, kind: input, shape index: {}]   ;;  %s540_s2 = inlined_call_operand.vmem [shape: f32[1,32], index: 2, kind: input, shape index: {}]   ;;  %s541_s3 = inlined_call_operand.hbm [shape: bf16[32,32], index: 3, kind: input, shape index: {}]   ;;  %s542_s4 = inlined_call_operand.vmem [shape: f32[1,32], index: 4, kind: input, shape index: {}]   ;;  %s543_s5 = inlined_call_operand.vmem [shape: bf16[32,128], index: 5, kind: input, shape index: {}]   ;;  %s544_s6 = inlined_call_operand.vmem [shape: f32[1,128], index: 6, kind: input, shape index: {}]   ;;  %s545_s7 = inlined_call_operand.hbm [shape: f32[8,128], index: 7, kind: output, shape index: {}]  }
   0x1   :  { %13 = vsyncpa [#allocation6], 0 }
   0x2   :  { %14 = vsyncpa [#allocation4], 0  ;;  %s427_s24 = smov [#allocation5]   ;;  %s428_s26 = smov [#allocation2]  }
   0x3   :  { %s31_s25 = sshll.u32 %s427_s24, 4  ;;  %s21_s27 = sshll.u32 %s428_s26, 4  ;;  %s32_s25 = int_to_ptr.vmem [resolvable:$true] %s31_s25  ;;  %s22_s27 = int_to_ptr.vmem [resolvable:$true] %s21_s27 }
   0x4   :  { %s333_s30 = scalar_lea.hbm %s539_s1, 64 }
   0x5   :  { %p334_p0 = scmp.ne.s32.totalorder %s539_s1, %s333_s30  ;;  %p337_p1 = scmp.lt.u32.totalorder %s333_s30, %s539_s1 }
   0x7   :  { %p339_p2 = pnand %p337_p1, %p334_p0 }
   0x9   :  { %342 = shalt.err (!%p339_p2)
}
   0xa   :  { %s343_s12 = scalar_lea.vmem %s32_s25, 64  ;;  %p348_p4 = scmp.lt.s32.totalorder %s32_s25, %s32_s25 }
   0xb   :  { %p344_p3 = scmp.ne.s32.totalorder %s32_s25, %s343_s12  ;;  %p349_p5 = scmp.lt.s32.totalorder %s343_s12, %s343_s12 }
   0xd   :  { %p350_p6 = por %p349_p5, %p348_p4 }
   0xf   :  { %p351_p7 = pnand %p350_p6, %p344_p3 }
  0x11   :  { %354 = shalt.err (!%p351_p7)
}
  0x12   :  { %34 = dma.hbm_to_vmem [thread:$0]  %s539_s1, 64, %s32_s25, [#allocation6]  }
  0x13   :  { %s355_s17 = scalar_lea.hbm %s538_s0, 128 }
  0x14   :  { %p356_p8 = scmp.ne.s32.totalorder %s538_s0, %s355_s17  ;;  %p359_p9 = scmp.lt.u32.totalorder %s355_s17, %s538_s0 }
  0x16   :  { %p361_p10 = pnand %p359_p9, %p356_p8 }
  0x18   :  { %364 = shalt.err (!%p361_p10)
}
  0x19   :  { %s365_s22 = scalar_lea.vmem %s22_s27, 128  ;;  %p370_p12 = scmp.lt.s32.totalorder %s22_s27, %s22_s27 }
  0x1a   :  { %p366_p11 = scmp.ne.s32.totalorder %s22_s27, %s365_s22  ;;  %p371_p13 = scmp.lt.s32.totalorder %s365_s22, %s365_s22 }
  0x1c   :  { %p372_p0 = por %p371_p13, %p370_p12 }
  0x1e   :  { %p373_p1 = pnand %p372_p0, %p366_p11 }
  0x20   :  { %376 = shalt.err (!%p373_p1)
}
  0x21   :  { %24 = dma.hbm_to_vmem [thread:$0]  %s538_s0, 128, %s22_s27, [#allocation3]  }
  0x22   :  { %s429_s24 = smov [#allocation7]   ;;  %s377_s29 = scalar_lea.hbm %s541_s3, 256 }
  0x23   :  { %s42_s25 = sshll.u32 %s429_s24, 4  ;;  %p378_p2 = scmp.ne.s32.totalorder %s541_s3, %s377_s29  ;;  %s43_s25 = int_to_ptr.vmem [resolvable:$true] %s42_s25 }
  0x24   :  { %p381_p3 = scmp.lt.u32.totalorder %s377_s29, %s541_s3 }
  0x26   :  { %p383_p4 = pnand %p381_p3, %p378_p2 }
  0x28   :  { %386 = shalt.err (!%p383_p4)
}
  0x29   :  { %s387_s11 = scalar_lea.vmem %s43_s25, 256  ;;  %p392_p6 = scmp.lt.s32.totalorder %s43_s25, %s43_s25 }
  0x2a   :  { %p388_p5 = scmp.ne.s32.totalorder %s43_s25, %s387_s11  ;;  %p393_p7 = scmp.lt.s32.totalorder %s387_s11, %s387_s11 }
  0x2c   :  { %p394_p8 = por %p393_p7, %p392_p6 }
  0x2e   :  { %p395_p9 = pnand %p394_p8, %p388_p5 }
  0x30   :  { %398 = shalt.err (!%p395_p9)
}
  0x31   :  { %s430_s0 = smov 64   ;;  %s431_s27 = smov 4  }
  0x32   :  { %48 = dma.hbm_to_vmem [thread:$0]  %s541_s3, 256, %s43_s25, [#allocation6], %s430_s0, %s430_s0, %s431_s27  }
  0x33   :  { %421 = dma.done.wait [#allocation3], 128  }
  0x34   :  { %422 = vsyncadd [#allocation3], 4294967168 }
  0x35   :  { %423 = dma.done.wait [#allocation6], 320  }
  0x36   :  { %424 = vsyncadd [#allocation6], 4294966976  ;;  %v432_v0 = vmov 0.0   ;;  %vm433_vm0 = vmmov 0   ;;  %vm79_vm1 = vcmask 1043456   ;;  %v65_v2 = vld [vmem:[#allocation2] sm:$0xff] }
  0x37   :  { %297 = vmatprep.subr.bf16.mxu0 %v432_v0  ;;  %299 = vmatprep.mubr.msk.bf16.mxu0 %vm433_vm0, %v432_v0  ;;  %v67_v1 = vld [vmem:[#allocation5] sm:$0xf]  ;;  %v66_v4 = vpack.c.bf16 %v65_v2, %v65_v2  ;;  %vm75_vm2 = vcmask 64512   ;;  %v327_v5 = vld [vmem:[#allocation7] sm:$0xff]   ;;  %v328_v6 = vld [vmem:[#allocation7 + $0x8] sm:$0xff]   ;;  %vm148_vm3 = vcmask 261120  }
  0x38   :  { %303 = vmatprep.subr.bf16.mxu1 %v432_v0  ;;  %307 = vmatprep.mubr.msk.bf16.mxu1 %vm433_vm0, %v432_v0  ;;  %v81_v3 = vsel %vm79_vm1, %v67_v1, 0  ;;  %v329_v7 = vld [vmem:[%s543_s5] sm:$0xff]   ;;  %v330_v16 = vld [vmem:[%s543_s5 + $0x8] sm:$0xff]   ;;  %s434_s5 = smov [#allocation8]  }
  0x39   :  { %298 = vmatpush3.bf16.msra.mxu0 %v81_v3  ;;  %304 = vmatpush3.bf16.msra.mxu1 %v327_v5  ;;  %v279_v8 = vld [vmem:[%s540_s2] ss:$0 sm:$0xff] }
  0x3a   :  { %311 = vmatprep.subr.bf16.mxu0 %v432_v0  ;;  %305 = vmatprep.subr.bf16.mxu1 %v432_v0  ;;  %v281_v17 = vld [vmem:[%s542_s4] ss:$0 sm:$0xff]  ;;  %s269_s4 = sshll.u32 %s434_s5, 4  ;;  %s270_s4 = int_to_ptr.vmem [resolvable:$true] %s269_s4 }
  0x3b   :  { %v285_v25 = vld [vmem:[%s544_s6] ss:$0 sm:$0xff]  ;;  %s399_s22 = scalar_lea.vmem %s270_s4, 128  ;;  %p404_p11 = scmp.lt.s32.totalorder %s270_s4, %s270_s4 }
  0x3c   :  { %300 = vmatmul.mubr.msk.bf16.vlgmr.msra.gmra.mrb[0].mxu0 %vm75_vm2, %v66_v4  ;;  %p400_p10 = scmp.ne.s32.totalorder %s270_s4, %s399_s22  ;;  %p405_p12 = scmp.lt.s32.totalorder %s399_s22, %s399_s22 }
  0x3d   :  { %315 = vmatprep.mubr.msk.bf16.mxu0 %vm433_vm0, %v432_v0  ;;  %306 = vmatpush3.bf16.msra.mxu1 %v328_v6 }
  0x3e   :  { %312 = vmatpush3.bf16.msra.mxu0 %v329_v7  ;;  %p406_p13 = por %p405_p12, %p404_p11 }
  0x3f   :  { %313 = vmatprep.subr.bf16.mxu0 %v432_v0 }
  0x40   :  { %p407_p0 = pnand %p406_p13, %p400_p10 }
  0x42   :  { %314 = vmatpush3.bf16.msra.mxu0 %v330_v16 }
 0x10f   :  { %v117_v9 = vpop.f32.mrb[0].mxu0 }
 0x110   :  { %v118_v10 = vadd.f32 %v279_v8, %v117_v9  ;;  %v301_v11 = vpop.f32.mrb[1].mxu0 }
 0x111   :  { %v120_v12 = vpop.f32.mrb[2].mxu0 }
 0x112   :  { %v123_v13 = vmax.f32 %v118_v10, 0.0  ;;  %v302_v14 = vpop.f32.mrb[3].mxu0 }
 0x114   :  { %v124_v15 = vpack.c.bf16 %v123_v13, %v123_v13 }
 0x116   :  { %308 = vmatmul.mubr.msk.bf16.vlgmr.msra.gmra.mrb[0].mxu1 %vm148_vm3, %v124_v15 }
 0x1e9   :  { %v186_v18 = vpop.f32.mrb[0].mxu1 }
 0x1ea   :  { %v187_v19 = vadd.f32 %v281_v17, %v186_v18  ;;  %v309_v20 = vpop.f32.mrb[1].mxu1 }
 0x1eb   :  { %v189_v21 = vpop.f32.mrb[2].mxu1 }
 0x1ec   :  { %v192_v22 = vmax.f32 %v187_v19, 0.0  ;;  %v310_v23 = vpop.f32.mrb[3].mxu1 }
 0x1ee   :  { %v193_v24 = vpack.c.bf16 %v192_v22, %v192_v22 }
 0x1f0   :  { %316 = vmatmul.mubr.msk.bf16.vlgmr.msra.gmra.mrb[4].mxu0 %vm148_vm3, %v193_v24 }
 0x2c3   :  { %v254_v26 = vpop.f32.mrb[4].mxu0 }
 0x2c4   :  { %v255_v27 = vadd.f32 %v285_v25, %v254_v26  ;;  %v317_v28 = vpop.f32.mrb[5].mxu0 }
 0x2c5   :  { %v257_v29 = vpop.f32.mrb[6].mxu0 }
 0x2c6   :  { %331 = vtanh.f32 %v255_v27  ;;  %v318_v30 = vpop.f32.mrb[7].mxu0 }
 0x2d0   :  { %v332_v31 = vpop.eup %331 }
 0x2d1   :  { %v261_v32 = vmul.f32 2.0, %v332_v31 }
 0x2d3   :  { %262 = vst [vmem:[#allocation8] sm:$0xff] %v261_v32 }
 0x2d4   :  { %410 = shalt.err (!%p407_p0)
}
 0x2d5   :  { %s411_s23 = scalar_lea.hbm %s545_s7, 128 }
 0x2d6   :  { %p412_p1 = scmp.ne.s32.totalorder %s545_s7, %s411_s23  ;;  %p415_p2 = scmp.lt.u32.totalorder %s411_s23, %s545_s7 }
 0x2d8   :  { %p417_p3 = pnand %p415_p2, %p412_p1 }
 0x2da   :  { %420 = shalt.err (!%p417_p3)
}
 0x2db   :  { %272 = dma.vmem_to_hbm [thread:$0]  %s270_s4, 128, %s545_s7, [#allocation4]  }
 0x2dc   :  { %425 = dma.done.wait [#allocation4], 128  }
 0x2dd   :  { %426 = vsyncadd [#allocation4], 4294967168 }
 0x2de   :  { %276 = vsyncpa [#allocation3], 1 }
 0x2df   :  { %277 = vsyncpa [#allocation6], 1 }
 0x2e0   :  { %278 = vsyncpa [#allocation4], 1 }

</bundles_post_ra>
